<compile_context>
chip_gen: v6e
topology: v6e:2x2x1
jax: 0.10.0
libtpu: 0.0.40
codegen_flags: <defaults>
</compile_context>

<pallas_src>
import functools

import numpy as np
import jax
import jax.numpy as jnp
from jax import lax
from jax.experimental import pallas as pl
from jax.experimental.pallas import tpu as pltpu


# ---------------------------------------------------------------------------
# small helpers
# ---------------------------------------------------------------------------
def _round_up(x, m):
    return ((x + m - 1) // m) * m


def _pad_rows(x, rows_p):
    pad = rows_p - x.shape[0]
    return x if pad == 0 else jnp.pad(x, ((0, pad), (0, 0)))


def _layernorm(x, g, b, eps=1e-5):
    mu = jnp.mean(x, axis=-1, keepdims=True)
    var = jnp.mean(jnp.square(x - mu), axis=-1, keepdims=True)
    return (x - mu) * jax.lax.rsqrt(var + eps) * g + b


def _gelu_tanh(x):
    # tanh approximation -> single EUP op instead of an erf polynomial on the VPU.
    c = 0.7978845608028654  # sqrt(2/pi)
    return 0.5 * x * (1.0 + jnp.tanh(c * (x + 0.044715 * x * x * x)))


@functools.lru_cache(maxsize=1)
def _vmem_limit_bytes():
    """Generation-aware VMEM budget (~75% of per-core VMEM, capped at 100 MiB)."""
    try:
        cap = int(pltpu.get_tpu_info().vmem_capacity_bytes)
        return int(min(100 * 1024 * 1024, max(32 * 1024 * 1024, (cap * 3) // 4)))
    except Exception:
        return 64 * 1024 * 1024


def _default_row_tile():
    # bigger tiles on 128-MiB VMEM parts (v5e/v6e), smaller on v7x (64 MiB).
    return 1024 if _vmem_limit_bytes() >= 80 * 1024 * 1024 else 512


def _plan_rows(rows, row_tile):
    row_tile = min(row_tile, _round_up(rows, 8))
    n_tiles = -(-rows // row_tile)
    if n_tiles > 1 and n_tiles % 2:
        n_tiles += 1  # even grid -> v7x's 2 TensorCores split the work evenly
    return row_tile, n_tiles * row_tile


def _relative_position_index(ws):
    coords = np.stack(np.meshgrid(np.arange(ws), np.arange(ws), indexing="ij"))
    flat = coords.reshape(2, -1)
    rel = flat[:, :, None] - flat[:, None, :]
    rel = rel.transpose(1, 2, 0).copy()
    rel[..., 0] += ws - 1
    rel[..., 1] += ws - 1
    rel[..., 0] *= 2 * ws - 1
    return rel.sum(-1)


def _split_rpe(table, ws, N, nh, hd):
    rel_idx = _relative_position_index(ws)
    rpe = table[rel_idx.reshape(-1)].reshape(ws * ws, ws * ws, nh, 3 * hd)
    rpe = jnp.repeat(jnp.repeat(rpe, N, axis=0), N, axis=1)   # [L, L, nh, 3*hd]
    return rpe[..., :hd], rpe[..., hd:2 * hd], rpe[..., 2 * hd:]


def precompute_rpe(rpe_table, ws, N, nh, hd, scale):
    """Precomputed once per layer (static gather + layout), hoisted out of forward."""
    q_e, k_e, v_e = _split_rpe(rpe_table, ws, N, nh, hd)       # each [i, j, nh, hd]
    qe = jnp.transpose(q_e * scale, (2, 0, 1, 3))              # [nh, i, j, hd] (pre-scaled)
    ke = jnp.transpose(k_e, (2, 0, 1, 3))                      # [nh, i, j, hd]
    ve = jnp.transpose(v_e, (2, 0, 1, 3))                      # [nh, i, j, hd]
    return qe, ke, ve


def _window_partition_heads(x, ws, nh):
    # 'b (i hs) (j ws) n (s h d) -> s (b i j) h (hs ws n) d'  (s = q/k/v)
    B, H, W, N, C3 = x.shape
    dim = C3 // 3
    hd = dim // nh
    i, j = H // ws, W // ws
    x = x.reshape(B, i, ws, j, ws, N, 3, nh, hd)
    x = x.transpose(6, 0, 1, 3, 7, 2, 4, 5, 8)      # 3, B, i, j, nh, hs, ws, N, hd
    x = x.reshape(3, B * i * j, nh, ws * ws * N, hd)
    return x[0], x[1], x[2]


def _window_reverse_heads(xw, B, H, W, ws, N, nh, hd):
    # '(b i j) h (hs ws n) d -> b (i hs) (j ws) n (h d)'
    i, j = H // ws, W // ws
    x = xw.reshape(B, i, j, nh, ws, ws, N, hd)
    x = x.transpose(0, 1, 4, 2, 5, 6, 3, 7)
    return x.reshape(B, H, W, N, nh * hd)


# ---------------------------------------------------------------------------
# Kernel 1: qkv projection with fused (tgt, abs_encoding) concat (two MXU dots)
# ---------------------------------------------------------------------------
def _qkv_proj_kernel(x_ref, e_ref, wx_ref, we_ref, b_ref, o_ref):
    cdt = wx_ref.dtype                                         # MXU compute dtype (bf16)
    acc = jnp.dot(x_ref[...].astype(cdt), wx_ref[...], preferred_element_type=jnp.float32)
    acc = acc + jnp.dot(e_ref[...].astype(cdt), we_ref[...], preferred_element_type=jnp.float32)
    o_ref[...] = (acc + b_ref[...]).astype(o_ref.dtype)


def qkv_proj(x, e, wx, we, b, *, out_dtype=None, row_tile=None):
    rows, cx = x.shape
    ce = e.shape[1]
    cout = wx.shape[1]
    out_dtype = out_dtype or x.dtype
    vlim = _vmem_limit_bytes()
    if row_tile is None:
        row_tile = _default_row_tile()
    row_tile, rows_p = _plan_rows(rows, row_tile)
    xp, ep = _pad_rows(x, rows_p), _pad_rows(e, rows_p)

    out = pl.pallas_call(
        _qkv_proj_kernel,
        out_shape=jax.ShapeDtypeStruct((rows_p, cout), out_dtype),
        grid=(rows_p // row_tile,),
        in_specs=[
            pl.BlockSpec((row_tile, cx), lambda i: (i, 0)),
            pl.BlockSpec((row_tile, ce), lambda i: (i, 0)),
            pl.BlockSpec((cx, cout), lambda i: (0, 0)),        # grid-invariant weights
            pl.BlockSpec((ce, cout), lambda i: (0, 0)),
            pl.BlockSpec((1, cout), lambda i: (0, 0)),
        ],
        out_specs=pl.BlockSpec((row_tile, cout), lambda i: (i, 0)),
        compiler_params=pltpu.CompilerParams(
            dimension_semantics=("parallel",),
            vmem_limit_bytes=vlim),
    )(xp, ep, wx, we, b)
    return out[:rows]


# ---------------------------------------------------------------------------
# Kernel 2: window attention, batched over (windows-in-block, heads)
# ---------------------------------------------------------------------------
def _window_attn_kernel(q_ref, k_ref, v_ref, qe_ref, ke_ref, ve_ref, mask_ref, o_ref):
    # q/k/v:   [wt, nh, L, hd]   (q already carries the softmax scale)
    # qe/ke/ve:[nh, L, L, hd]    (qe pre-scaled), grid-invariant
    # mask:    [wt, L, L]
    wt, nh, L, hd = q_ref.shape
    cdt = q_ref.dtype                        # MXU dtype follows activation dtype (bf16)
    q = q_ref[...]
    k = k_ref[...]
    v = v_ref[...]

    # content scores: one batched MXU dot_general over all (window, head) pairs
    qk = lax.dot_general(
        q.reshape(wt * nh, L, hd), k.reshape(wt * nh, L, hd),
        (((2,), (2,)), ((0,), (0,))),
        preferred_element_type=jnp.float32).reshape(wt, nh, L, L)

    # relative-position terms: VPU broadcast-multiply + reduce, emitted directly in
    # [w, h, i, j] orientation (no M=1 matmuls, no transposes).
    qr = jnp.sum(q[:, :, :, None, :] * ke_ref[...][None], axis=-1)   # [wt, nh, L, L]
    kr = jnp.sum(k[:, :, None, :, :] * qe_ref[...][None], axis=-1)   # [wt, nh, L, L]

    attn = qk + qr + kr + mask_ref[...][:, None, :, :]
    attn = attn - jnp.max(attn, axis=-1, keepdims=True)
    p = jnp.exp(attn)
    denom = jnp.sum(p, axis=-1, keepdims=True)
    p = p * pl.reciprocal(denom, approx=True)                        # EUP slot

    pv = lax.dot_general(
        p.reshape(wt * nh, L, L).astype(cdt), v.reshape(wt * nh, L, hd),
        (((2,), (1,)), ((0,), (0,))),
        preferred_element_type=jnp.float32).reshape(wt, nh, L, hd)
    pve = jnp.sum(p[..., None] * ve_ref[...][None], axis=3)          # [wt, nh, L, hd]
    o_ref[...] = (pv + pve).astype(o_ref.dtype)


def _choose_wt(num_windows, n_masks, target):
    cands = [wt for wt in range(min(target, num_windows), 0, -1)
             if num_windows % wt == 0 and (wt % n_masks == 0 or n_masks % wt == 0)]
    if not cands:
        return 1  # NOTE: wt=1 fallback craters throughput; pad BW upstream if hit.
    even = [wt for wt in cands if (num_windows // wt) % 2 == 0]      # v7x: 2 TCs
    return max(even) if even else max(cands)


def window_attention(q_w, k_w, v_w, qe, ke, ve, mask, *, out_dtype=None, wt_target=None):
    BW, nh, L, hd = q_w.shape
    nW = mask.shape[0]
    out_dtype = out_dtype or q_w.dtype
    vlim = _vmem_limit_bytes()
    if wt_target is None:
        wt_target = 8 if vlim >= 80 * 1024 * 1024 else 4   # smaller blocks on v7x
    wt = _choose_wt(BW, nW, wt_target)
    n_blocks = BW // wt

    # windows are ordered b-major then (i, j); window w uses mask w % nW
    if wt % nW == 0:
        mask_in = jnp.tile(mask, (wt // nW, 1, 1))                    # [wt, L, L]
        mask_spec = pl.BlockSpec((wt, L, L), lambda wb: (0, 0, 0))
    else:  # nW % wt == 0
        period = nW // wt
        mask_in = mask                                                # [nW, L, L]
        mask_spec = pl.BlockSpec((wt, L, L), lambda wb: (wb % period, 0, 0))

    blk = pl.BlockSpec((wt, nh, L, hd), lambda wb: (wb, 0, 0, 0))
    inv = lambda shape: pl.BlockSpec(shape, lambda wb: (0,) * len(shape))

    return pl.pallas_call(
        _window_attn_kernel,
        out_shape=jax.ShapeDtypeStruct((BW, nh, L, hd), out_dtype),
        grid=(n_blocks,),
        in_specs=[blk, blk, blk,
                  inv(qe.shape), inv(ke.shape), inv(ve.shape),   # grid-invariant RPE
                  mask_spec],
        out_specs=pl.BlockSpec((wt, nh, L, hd), lambda wb: (wb, 0, 0, 0)),
        compiler_params=pltpu.CompilerParams(
            dimension_semantics=("parallel",),
            vmem_limit_bytes=vlim),
    )(q_w, k_w, v_w, qe, ke, ve, mask_in)


# ---------------------------------------------------------------------------
# Kernel 3: fused proj + residual + LN1 + MLP(tanh-GELU) + residual + LN2
# ---------------------------------------------------------------------------
def _post_kernel(msg_ref, sc_ref, pw_ref, pb_ref, g1_ref, b1_ref,
                 w1_ref, bb1_ref, w2_ref, bb2_ref, g2_ref, b2_ref, o_ref):
    cdt = pw_ref.dtype
    msg = jnp.dot(msg_ref[...].astype(cdt), pw_ref[...],
                  preferred_element_type=jnp.float32) + pb_ref[...]
    x = sc_ref[...] + msg
    x = _layernorm(x, g1_ref[...], b1_ref[...])
    h = jnp.dot(x.astype(cdt), w1_ref[...], preferred_element_type=jnp.float32) + bb1_ref[...]
    h = _gelu_tanh(h)
    y = x + jnp.dot(h.astype(cdt), w2_ref[...], preferred_element_type=jnp.float32) + bb2_ref[...]
    o_ref[...] = _layernorm(y, g2_ref[...], b2_ref[...]).astype(o_ref.dtype)


def post_block(msg, shortcut, params, *, act_dtype=jnp.float32, row_tile=None):
    rows, dim = msg.shape
    hidden = params["w_fc1"].shape[1]
    vlim = _vmem_limit_bytes()
    if row_tile is None:
        row_tile = _default_row_tile()
    row_tile, rows_p = _plan_rows(rows, row_tile)
    msg_p, sc_p = _pad_rows(msg, rows_p), _pad_rows(shortcut, rows_p)

    w_proj = params["w_proj"].astype(act_dtype)
    w_fc1 = params["w_fc1"].astype(act_dtype)
    w_fc2 = params["w_fc2"].astype(act_dtype)

    inv = lambda shape: pl.BlockSpec(shape, lambda i: (0, 0))
    out = pl.pallas_call(
        _post_kernel,
        out_shape=jax.ShapeDtypeStruct((rows_p, dim), jnp.float32),
        grid=(rows_p // row_tile,),
        in_specs=[
            pl.BlockSpec((row_tile, dim), lambda i: (i, 0)),   # msg
            pl.BlockSpec((row_tile, dim), lambda i: (i, 0)),   # shortcut
            inv((dim, dim)), inv((1, dim)),                    # proj
            inv((1, dim)), inv((1, dim)),                      # norm1
            inv((dim, hidden)), inv((1, hidden)),              # mlp fc1
            inv((hidden, dim)), inv((1, dim)),                 # mlp fc2
            inv((1, dim)), inv((1, dim)),                      # norm2
        ],
        out_specs=pl.BlockSpec((row_tile, dim), lambda i: (i, 0)),
        compiler_params=pltpu.CompilerParams(
            dimension_semantics=("parallel",),
            vmem_limit_bytes=vlim),
    )(msg_p, sc_p, w_proj, params["b_proj"], params["ln1_g"], params["ln1_b"],
      w_fc1, params["b_fc1"], w_fc2, params["b_fc2"],
      params["ln2_g"], params["ln2_b"])
    return out[:rows]


# ---------------------------------------------------------------------------
# Full forward (RefinementLayer.forward with normalize_before=False -> forward_post)
# ---------------------------------------------------------------------------
def refinement_layer_forward(tgt, abs_enc, attn_mask, ht, wd, params, cfg, rpe_pre=None):
    dim, nh, ws, shift = cfg["dim"], cfg["n_heads"], cfg["window_size"], cfg["shift_size"]
    act_dtype = cfg.get("act_dtype", jnp.bfloat16)
    N = tgt.shape[1]
    hd = dim // nh
    scale = hd ** -0.5
    M = tgt.shape[0]
    B = M // (ht * wd)

    if rpe_pre is None:  # hoisted / cached per layer in production
        rpe_pre = precompute_rpe(params["rpe_table"], ws, N, nh, hd, scale)
    qe, ke, ve = rpe_pre

    # fold the softmax scale into the q-columns of the qkv projection (free at runtime)
    col_scale = jnp.concatenate([jnp.full((dim,), scale, jnp.float32),
                                 jnp.ones((2 * dim,), jnp.float32)])
    w_qkv = params["w_qkv"] * col_scale[None, :]
    b_qkv = params["b_qkv"] * col_scale[None, :]
    wx = w_qkv[:dim].astype(act_dtype)
    we = w_qkv[dim:].astype(act_dtype)

    # qkv projection with the (tgt, abs_encoding) concat fused into two dots
    qkv = qkv_proj(tgt.reshape(M * N, dim), abs_enc.reshape(M * N, -1),
                   wx, we, b_qkv, out_dtype=act_dtype)
    qkv = qkv.reshape(B, ht, wd, N, 3 * dim)
    if shift > 0:
        qkv = jnp.roll(qkv, (-shift, -shift), axis=(1, 2))
    q_w, k_w, v_w = _window_partition_heads(qkv, ws, nh)       # each [BW, nh, L, hd]

    # finite large-negative mask (robust against fully-masked rows)
    mask = jnp.maximum(attn_mask.astype(jnp.float32), jnp.float32(-1e9))

    xw = window_attention(q_w, k_w, v_w, qe, ke, ve, mask, out_dtype=act_dtype)

    x = _window_reverse_heads(xw, B, ht, wd, ws, N, nh, hd)
    if shift > 0:
        x = jnp.roll(x, (shift, shift), axis=(1, 2))
    msg = x.reshape(M * N, dim)

    out = post_block(msg, tgt.reshape(M * N, dim), params, act_dtype=act_dtype)
    return out.reshape(M, N, dim)


# ---------------------------------------------------------------------------
# Pure-JAX reference (mirrors the PyTorch module, f32)
# ---------------------------------------------------------------------------
def _window_partition_ref(x, ht, wd, ws, N, nh, hd):
    b = x.shape[0]
    i, j = ht // ws, wd // ws
    x = x.reshape(b, i, ws, j, ws, N, nh, hd)
    x = x.transpose(0, 1, 3, 6, 2, 4, 5, 7)
    return x.reshape(b * i * j, nh, ws * ws * N, hd)


def _window_reverse_ref(xw, B, ht, wd, ws, N, nh, hd):
    i, j = ht // ws, wd // ws
    x = xw.reshape(B, i, j, nh, ws, ws, N, hd)
    x = x.transpose(0, 1, 4, 2, 5, 6, 3, 7)
    return x.reshape(B, ht, wd, N, nh * hd)


def ref_forward(tgt, abs_enc, attn_mask, ht, wd, params, cfg):
    dim, nh, ws, shift = cfg["dim"], cfg["n_heads"], cfg["window_size"], cfg["shift_size"]
    N = tgt.shape[1]
    hd = dim // nh
    scale = hd ** -0.5
    M = tgt.shape[0]
    B = M // (ht * wd)
    L = ws * ws * N

    qkv_in = jnp.concatenate([tgt, abs_enc], axis=-1).reshape(M * N, -1)
    qkv = qkv_in @ params["w_qkv"] + params["b_qkv"]
    qkv = qkv.reshape(B, ht, wd, N, 3 * dim)
    if shift > 0:
        qkv = jnp.roll(qkv, (-shift, -shift), axis=(1, 2))
    q = _window_partition_ref(qkv[..., :dim], ht, wd, ws, N, nh, hd)
    k = _window_partition_ref(qkv[..., dim:2 * dim], ht, wd, ws, N, nh, hd)
    v = _window_partition_ref(qkv[..., 2 * dim:], ht, wd, ws, N, nh, hd)
    q_e, k_e, v_e = _split_rpe(params["rpe_table"], ws, N, nh, hd)

    qk = jnp.einsum("whic,whjc->whij", q * scale, k)
    qr = jnp.einsum("whic,ijhc->whij", q * scale, k_e)
    kr = jnp.einsum("whjc,ijhc->whij", k, q_e * scale)
    attn = qk + qr + kr
    nW = attn_mask.shape[0]
    attn = attn.reshape(B, nW, nh, L, L) + attn_mask[None, :, None, :, :]
    attn = jax.nn.softmax(attn.reshape(B * nW, nh, L, L), axis=-1)
    xw = jnp.einsum("whij,whjc->whic", attn, v) + jnp.einsum("whij,ijhc->whic", attn, v_e)

    x = _window_reverse_ref(xw, B, ht, wd, ws, N, nh, hd)
    if shift > 0:
        x = jnp.roll(x, (shift, shift), axis=(1, 2))
    msg = x.reshape(M * N, dim)
    msg = msg @ params["w_proj"] + params["b_proj"]
    x = tgt.reshape(M * N, dim) + msg
    x = _layernorm(x, params["ln1_g"], params["ln1_b"])
    h = jax.nn.gelu(x @ params["w_fc1"] + params["b_fc1"], approximate=False)
    x = x + (h @ params["w_fc2"] + params["b_fc2"])
    x = _layernorm(x, params["ln2_g"], params["ln2_b"])
    return x.reshape(M, N, dim)


# ---------------------------------------------------------------------------
# Deterministic parameter init (shapes follow the torch __init__)
# ---------------------------------------------------------------------------
def init_params(key, dim, n_heads, window_size, mlp_ratio):
    qkv_dim = dim + 31
    hidden = int(dim * mlp_ratio)
    keys = jax.random.split(key, 8)
    return {
        "w_qkv": 0.10 * jax.random.normal(keys[0], (qkv_dim, 3 * dim), jnp.float32),
        "b_qkv": 0.05 * jax.random.normal(keys[1], (1, 3 * dim), jnp.float32),
        # torch inits the RPE table to zeros; small randoms so the path is exercised
        "rpe_table": 0.02 * jax.random.normal(
            keys[2], ((2 * window_size - 1) * (2 * window_size - 1), 3 * dim), jnp.float32),
        "w_proj": 0.10 * jax.random.normal(keys[3], (dim, dim), jnp.float32),
        "b_proj": 0.05 * jax.random.normal(keys[4], (1, dim), jnp.float32),
        "ln1_g": jnp.ones((1, dim), jnp.float32),
        "ln1_b": jnp.zeros((1, dim), jnp.float32),
        "w_fc1": 0.10 * jax.random.normal(keys[5], (dim, hidden), jnp.float32),
        "b_fc1": 0.05 * jax.random.normal(keys[6], (1, hidden), jnp.float32),
        "w_fc2": 0.10 * jax.random.normal(keys[7], (hidden, dim), jnp.float32),
        "b_fc2": jnp.zeros((1, dim), jnp.float32),
        "ln2_g": jnp.ones((1, dim), jnp.float32),
        "ln2_b": jnp.zeros((1, dim), jnp.float32),
    }


def gen_window_attn_mask(window_size):
    # WindowAttention.gen_window_attn_mask (self-edge mask), returns [L, L]
    wh, ww, n = window_size
    idx = np.arange(wh * ww, dtype=np.float32).reshape(-1, 1)
    idx = np.broadcast_to(idx, (wh * ww, n)).reshape(-1)
    diff = idx[:, None] - idx[None, :]
    mask = np.where(diff == 0, -np.inf, 0.0).astype(np.float32)
    np.fill_diagonal(mask, 0.0)
    return jnp.asarray(mask)


if __name__ == "__main__":
    B, ht, wd, N = 2, 8, 8, 1
    dim, n_heads, window_size, shift_size, mlp_ratio = 32, 2, 4, 0, 4.0
    cfg = dict(dim=dim, n_heads=n_heads, window_size=window_size, shift_size=shift_size,
               act_dtype=jnp.bfloat16)   # bf16 MXU operands / activations, f32 statistics

    key = jax.random.PRNGKey(0)
    k1, k2, k3 = jax.random.split(key, 3)
    params = init_params(k3, dim, n_heads, window_size, mlp_ratio)

    tgt = 0.5 * jax.random.normal(k1, (B * ht * wd, N, dim), jnp.float32)
    abs_enc = 0.5 * jax.random.normal(k2, (B * ht * wd, N, 31), jnp.float32)

    L = window_size * window_size * N
    nW = (ht // window_size) * (wd // window_size)
    attn_mask = jnp.broadcast_to(gen_window_attn_mask((window_size, window_size, N))[None],
                                 (nW, L, L))

    hd = dim // n_heads
    rpe_pre = precompute_rpe(params["rpe_table"], window_size, N, n_heads, hd, hd ** -0.5)

    out = refinement_layer_forward(tgt, abs_enc, attn_mask, ht, wd, params, cfg,
                                   rpe_pre=rpe_pre)
    out = jax.block_until_ready(out)

    ref = jax.block_until_ready(ref_forward(tgt, abs_enc, attn_mask, ht, wd, params, cfg))
    err = float(jnp.max(jnp.abs(out - ref)))
    assert bool(jnp.all(jnp.isfinite(out))), "non-finite output"
    # tolerance covers bf16 MXU/activation rounding + tanh-GELU + approx reciprocal
    assert err < 6e-2, f"mismatch vs reference: {err}"

    print("KERNEL_OK")
</pallas_src>

<mosaic_0001>
module attributes {stable_mosaic.version = 11 : i64} {
  func.func @_qkv_proj_kernel(%arg0: i32, %arg1: memref<128x32xf32, #tpu.memory_space<vmem>>, %arg2: memref<128x31xf32, #tpu.memory_space<vmem>>, %arg3: memref<32x96xbf16, #tpu.memory_space<vmem>>, %arg4: memref<31x96xbf16, #tpu.memory_space<vmem>>, %arg5: memref<1x96xf32, #tpu.memory_space<vmem>>, %arg6: memref<128x96xbf16, #tpu.memory_space<vmem>>) attributes {dimension_semantics = [#tpu.dimension_semantics<parallel>], iteration_bounds = array<i64: 1>, scalar_prefetch = 0 : i64, scratch_operands = 0 : i64, tpu.core_type = #tpu.core_type<tc>, window_params = [{transform_indices = @transform_0, window_bounds = array<i64: 128, 32>}, {transform_indices = @transform_1, window_bounds = array<i64: 128, 31>}, {pipeline_mode = #tpu.pipeline_mode<synchronous>, transform_indices = @transform_2, window_bounds = array<i64: 32, 96>}, {pipeline_mode = #tpu.pipeline_mode<synchronous>, transform_indices = @transform_3, window_bounds = array<i64: 31, 96>}, {pipeline_mode = #tpu.pipeline_mode<synchronous>, transform_indices = @transform_4, window_bounds = array<i64: 1, 96>}, {transform_indices = @transform_5, window_bounds = array<i64: 128, 96>}]} {
    %c0 = arith.constant 0 : index
    %c0_0 = arith.constant 0 : index
    %0 = vector.load %arg1[%c0, %c0_0] : memref<128x32xf32, #tpu.memory_space<vmem>>, vector<128x32xf32>
    %1 = arith.truncf %0 : vector<128x32xf32> to vector<128x32xbf16>
    %c0_1 = arith.constant 0 : index
    %c0_2 = arith.constant 0 : index
    %2 = vector.load %arg3[%c0_1, %c0_2] : memref<32x96xbf16, #tpu.memory_space<vmem>>, vector<32x96xbf16>
    %cst = arith.constant dense<0.000000e+00> : vector<128x96xf32>
    %3 = tpu.matmul %1, %2, %cst {dimension_numbers = #tpu.dot_dimension_numbers<[1], [0], [0], [1], [0, 0, 1, 1], [], []>} : vector<128x32xbf16>, vector<32x96xbf16>, vector<128x96xf32> -> vector<128x96xf32>
    %c0_3 = arith.constant 0 : index
    %c0_4 = arith.constant 0 : index
    %4 = vector.load %arg2[%c0_3, %c0_4] : memref<128x31xf32, #tpu.memory_space<vmem>>, vector<128x31xf32>
    %5 = arith.truncf %4 : vector<128x31xf32> to vector<128x31xbf16>
    %c0_5 = arith.constant 0 : index
    %c0_6 = arith.constant 0 : index
    %6 = vector.load %arg4[%c0_5, %c0_6] : memref<31x96xbf16, #tpu.memory_space<vmem>>, vector<31x96xbf16>
    %cst_7 = arith.constant dense<0.000000e+00> : vector<128x96xf32>
    %7 = tpu.matmul %5, %6, %cst_7 {dimension_numbers = #tpu.dot_dimension_numbers<[1], [0], [0], [1], [0, 0, 1, 1], [], []>} : vector<128x31xbf16>, vector<31x96xbf16>, vector<128x96xf32> -> vector<128x96xf32>
    %8 = arith.addf %3, %7 : vector<128x96xf32>
    %c0_8 = arith.constant 0 : index
    %c0_9 = arith.constant 0 : index
    %9 = vector.load %arg5[%c0_8, %c0_9] : memref<1x96xf32, #tpu.memory_space<vmem>>, vector<1x96xf32>
    %10 = vector.broadcast %9 : vector<1x96xf32> to vector<128x96xf32>
    %11 = arith.addf %8, %10 : vector<128x96xf32>
    %12 = arith.truncf %11 : vector<128x96xf32> to vector<128x96xbf16>
    %c0_10 = arith.constant 0 : index
    %c0_11 = arith.constant 0 : index
    %13 = vector.load %arg6[%c0_10, %c0_11] : memref<128x96xbf16, #tpu.memory_space<vmem>>, vector<128x96xbf16>
    tpu.vector_store %arg6[%c0_10, %c0_11], %12 {strides = array<i32>} : memref<128x96xbf16, #tpu.memory_space<vmem>>, vector<128x96xbf16>,
    return
  }
  func.func @transform_0(%arg0: i32) -> (i32, i32) {
    %c0_i32 = arith.constant 0 : i32
    %c0_i32_0 = arith.constant 0 : i32
    return %arg0, %c0_i32 : i32, i32
  }
  func.func @transform_1(%arg0: i32) -> (i32, i32) {
    %c0_i32 = arith.constant 0 : i32
    %c0_i32_0 = arith.constant 0 : i32
    return %arg0, %c0_i32 : i32, i32
  }
  func.func @transform_2(%arg0: i32) -> (i32, i32) {
    %c0_i32 = arith.constant 0 : i32
    %c0_i32_0 = arith.constant 0 : i32
    %c0_i32_1 = arith.constant 0 : i32
    return %c0_i32, %c0_i32_0 : i32, i32
  }
  func.func @transform_3(%arg0: i32) -> (i32, i32) {
    %c0_i32 = arith.constant 0 : i32
    %c0_i32_0 = arith.constant 0 : i32
    %c0_i32_1 = arith.constant 0 : i32
    return %c0_i32, %c0_i32_0 : i32, i32
  }
  func.func @transform_4(%arg0: i32) -> (i32, i32) {
    %c0_i32 = arith.constant 0 : i32
    %c0_i32_0 = arith.constant 0 : i32
    %c0_i32_1 = arith.constant 0 : i32
    return %c0_i32, %c0_i32_0 : i32, i32
  }
  func.func @transform_5(%arg0: i32) -> (i32, i32) {
    %c0_i32 = arith.constant 0 : i32
    %c0_i32_0 = arith.constant 0 : i32
    return %arg0, %c0_i32 : i32, i32
  }
}

</mosaic_0001>

<bundles_post_ra>
// kernel: tpu_custom_call.1
= control target key start
LH: loop header
LB: loop body
LE: loop exit
PB: predicated region body
PF: predicated region fallthrough
CT: control target
= control target key end

     0   :  { %vm113_vm0 = vcmask 1046528   ;;  %vm114_vm1 = vcmask 1047552   ;;  %v577_v1 = vmov 65535   ;;  %vm229_vm2 = vcmask 261120   ;;  %s817_s2 = inlined_call_operand.vmem [shape: bf16[32,96], index: 2, kind: input, shape index: {}]   ;;  %s818_s3 = inlined_call_operand.vmem [shape: bf16[31,96], index: 3, kind: input, shape index: {}]   ;;  %s819_s0 = inlined_call_operand.vmem [shape: f32[128,32], index: 0, kind: input, shape index: {}]   ;;  %s820_s1 = inlined_call_operand.vmem [shape: f32[128,31], index: 1, kind: input, shape index: {}]   ;;  %s821_s4 = inlined_call_operand.vmem [shape: f32[1,96], index: 4, kind: input, shape index: {}]   ;;  %s822_s5 = inlined_call_operand.vmem [shape: bf16[128,96], index: 5, kind: output, shape index: {}]  }
   0x1   :  { %v573_v0 = vld [vmem:[%s817_s2 + $0x8] sm:$0xff]   ;;  %v115_v2 = vsel %vm113_vm0, 4294967295, %v577_v1  ;;  %v575_v5 = vld [vmem:[%s817_s2] sm:$0xff]   ;;  %v23_v10 = vld [vmem:[%s819_s0 + $0x10] sm:$0xff]  ;;  %vm88_vm3 = vcmask 252928   ;;  %vm438_vm4 = vcmask 781312  }
   0x2   :  { %v574_v3 = vld [vmem:[%s818_s3 + $0x8] sm:$0xff]   ;;  %v116_v4 = vsel %vm114_vm1, %v115_v2, 0  ;;  %552 = vmatprep.subr.bf16.mxu1 %v573_v0  ;;  %v576_v7 = vld [vmem:[%s818_s3] sm:$0xff]   ;;  %v24_v12 = vld [vmem:[%s819_s0 + $0x18] sm:$0xff] }
   0x3   :  { %553 = vmatpush3.bf16.msra.mxu1 %v573_v0  ;;  %v118_v6 = vand.u32 %v574_v3, %v116_v4  ;;  %v21_v8 = vld [vmem:[%s819_s0] sm:$0xff]  ;;  %v22_v9 = vld [vmem:[%s819_s0 + $0x8] sm:$0xff]  ;;  %v38_v15 = vpack.c.bf16 %v24_v12, %v23_v10  ;;  %v51_v17 = vld [vmem:[%s820_s1 + $0x10] sm:$0xff] }
   0x4   :  { %554 = vmatprep.subr.bf16.mxu1 %v575_v5  ;;  %v37_v11 = vpack.c.bf16 %v22_v9, %v21_v8  ;;  %v49_v13 = vld [vmem:[%s820_s1] sm:$0xff]  ;;  %v50_v14 = vld [vmem:[%s820_s1 + $0x8] sm:$0xff]  ;;  %v52_v18 = vld [vmem:[%s820_s1 + $0x18] sm:$0xff] }
   0x5   :  { %532 = vmatprep.subr.bf16.mxu0 %v118_v6  ;;  %v65_v16 = vpack.c.bf16 %v50_v14, %v49_v13  ;;  %v25_v19 = vld [vmem:[%s819_s0 + $0x20] sm:$0xff]  ;;  %v26_v20 = vld [vmem:[%s819_s0 + $0x28] sm:$0xff]  ;;  %v66_v24 = vpack.c.bf16 %v52_v18, %v51_v17  ;;  %v27_v26 = vld [vmem:[%s819_s0 + $0x30] sm:$0xff] }
   0x6   :  { %533 = vmatpush3.bf16.msra.mxu0 %v118_v6  ;;  %556 = vmatprep.mubr.msk.bf16.mxu1 %vm229_vm2, %v37_v11  ;;  %v39_v21 = vpack.c.bf16 %v26_v20, %v25_v19  ;;  %v53_v22 = vld [vmem:[%s820_s1 + $0x20] sm:$0xff]  ;;  %v54_v23 = vld [vmem:[%s820_s1 + $0x28] sm:$0xff]  ;;  %v28_v27 = vld [vmem:[%s819_s0 + $0x38] sm:$0xff] }
   0x7   :  { %555 = vmatpush3.bf16.msra.mxu1 %v575_v5  ;;  %534 = vmatprep.subr.bf16.mxu0 %v576_v7  ;;  %v67_v25 = vpack.c.bf16 %v54_v23, %v53_v22  ;;  %v29_v28 = vld [vmem:[%s819_s0 + $0x40] sm:$0xff]  ;;  %v30_v29 = vld [vmem:[%s819_s0 + $0x48] sm:$0xff]  ;;  %v40_v30 = vpack.c.bf16 %v28_v27, %v27_v26  ;;  %v55_v31 = vld [vmem:[%s820_s1 + $0x30] sm:$0xff] }
   0x8   :  { %536 = vmatprep.mubr.msk.bf16.mxu0 %vm88_vm3, %v65_v16  ;;  %v56_v32 = vld [vmem:[%s820_s1 + $0x38] sm:$0xff]  ;;  %v41_v33 = vpack.c.bf16 %v30_v29, %v29_v28  ;;  %v57_v34 = vld [vmem:[%s820_s1 + $0x40] sm:$0xff]  ;;  %v58_v35 = vld [vmem:[%s820_s1 + $0x48] sm:$0xff] }
   0x9   :  { %v68_v36 = vpack.c.bf16 %v56_v32, %v55_v31  ;;  %v69_v37 = vpack.c.bf16 %v58_v35, %v57_v34  ;;  %v31_v38 = vld [vmem:[%s819_s0 + $0x50] sm:$0xff]  ;;  %v32_v39 = vld [vmem:[%s819_s0 + $0x58] sm:$0xff]  ;;  %v33_v40 = vld [vmem:[%s819_s0 + $0x60] sm:$0xff] }
   0xa   :  { %535 = vmatpush3.bf16.msra.mxu0 %v576_v7  ;;  %557 = vmatmul.mubr.msk.bf16.vlgmr.msra.gmra.mxu1 %vm229_vm2, %v38_v15  ;;  %v34_v41 = vld [vmem:[%s819_s0 + $0x68] sm:$0xff]  ;;  %v42_v42 = vpack.c.bf16 %v32_v39, %v31_v38  ;;  %v59_v43 = vld [vmem:[%s820_s1 + $0x50] sm:$0xff]  ;;  %v60_v44 = vld [vmem:[%s820_s1 + $0x58] sm:$0xff] }
   0xb   :  { %560 = vmatprep.mubr.msk.bf16.mxu1 %vm229_vm2, %v39_v21  ;;  %v43_v45 = vpack.c.bf16 %v34_v41, %v33_v40  ;;  %v61_v46 = vld [vmem:[%s820_s1 + $0x60] sm:$0xff]  ;;  %v62_v47 = vld [vmem:[%s820_s1 + $0x68] sm:$0xff]  ;;  %v70_v48 = vpack.c.bf16 %v60_v44, %v59_v43  ;;  %v35_v50 = vld [vmem:[%s819_s0 + $0x70] sm:$0xff] }
   0xc   :  { %v71_v49 = vpack.c.bf16 %v62_v47, %v61_v46  ;;  %v36_v51 = vld [vmem:[%s819_s0 + $0x78] sm:$0xff]  ;;  %v63_v53 = vld [vmem:[%s820_s1 + $0x70] sm:$0xff]  ;;  %v735_v59 = vld [vmem:[%s821_s4] ss:$0 sm:$0xff] }
   0xd   :  { %537 = vmatmul.mubr.msk.bf16.vlgmr.msra.gmra.mxu0 %vm88_vm3, %v66_v24  ;;  %v44_v52 = vpack.c.bf16 %v36_v51, %v35_v50  ;;  %v64_v54 = vld [vmem:[%s820_s1 + $0x78] sm:$0xff] }
   0xe   :  { %540 = vmatprep.mubr.msk.bf16.mxu0 %vm88_vm3, %v67_v25  ;;  %v72_v55 = vpack.c.bf16 %v64_v54, %v63_v53 }
  0x12   :  { %561 = vmatmul.mubr.msk.bf16.gmra.mxu1 %vm229_vm2, %v40_v30 }
  0x13   :  { %564 = vmatprep.mubr.msk.bf16.mxu1 %vm229_vm2, %v41_v33 }
  0x15   :  { %541 = vmatmul.mubr.msk.bf16.gmra.mxu0 %vm88_vm3, %v68_v36 }
  0x16   :  { %544 = vmatprep.mubr.msk.bf16.mxu0 %vm88_vm3, %v69_v37 }
  0x1a   :  { %565 = vmatmul.mubr.msk.bf16.gmra.mxu1 %vm229_vm2, %v42_v42 }
  0x1b   :  { %568 = vmatprep.mubr.msk.bf16.mxu1 %vm229_vm2, %v43_v45 }
  0x1d   :  { %545 = vmatmul.mubr.msk.bf16.gmra.mxu0 %vm88_vm3, %v70_v48 }
  0x1e   :  { %548 = vmatprep.mubr.msk.bf16.mxu0 %vm88_vm3, %v71_v49 }
  0x22   :  { %569 = vmatmul.mubr.msk.bf16.gmra.mxu1 %vm229_vm2, %v44_v52 }
  0x25   :  { %549 = vmatmul.mubr.msk.bf16.gmra.mxu0 %vm88_vm3, %v72_v55 }
  0xca   :  { %v558_v56 = vpop.f32.mrf.mxu1 }
  0xcc   :  { %v288_v57 = vpop.f32.mrf.mxu1 }
  0xcd   :  { %v538_v58 = vpop.f32.mrf.mxu0 }
  0xce   :  { %v297_v60 = vadd.f32 %v558_v56, %v538_v58  ;;  %v559_v61 = vpop.f32.mrf.mxu1 }
  0xcf   :  { %v154_v62 = vpop.f32.mrf.mxu0 }
  0xd0   :  { %v360_v63 = vadd.f32 %v735_v59, %v297_v60  ;;  %v289_v0 = vadd.f32 %v288_v57, %v154_v62  ;;  %v291_v1 = vpop.f32.mrf.mxu1 }
  0xd1   :  { %v539_v2 = vpop.f32.mrf.mxu0 }
  0xd2   :  { %v498_v3 = vpack.c.bf16 %v360_v63, %v360_v63  ;;  %v358_v4 = vadd.f32 %v735_v59, %v289_v0  ;;  %v300_v5 = vadd.f32 %v559_v61, %v539_v2  ;;  %v562_v6 = vpop.f32.mrf.mxu1 }
  0xd3   :  { %v157_v7 = vpop.f32.mrf.mxu0 }
  0xd4   :  { %441 = vst.msk [vmem:[%s822_s5 + $0x8] sm:$0xf] %vm438_vm4, %v498_v3  ;;  %v496_v8 = vpack.c.bf16 %v358_v4, %v358_v4  ;;  %v361_v9 = vadd.f32 %v735_v59, %v300_v5  ;;  %v292_v10 = vadd.f32 %v291_v1, %v157_v7  ;;  %v304_v11 = vpop.f32.mrf.mxu1 }
  0xd5   :  { %v542_v12 = vpop.f32.mrf.mxu0 }
  0xd6   :  { %439 = vst.msk [vmem:[%s822_s5] sm:$0xf] %vm438_vm4, %v496_v8  ;;  %v499_v13 = vpack.c.bf16 %v361_v9, %v361_v9  ;;  %v359_v14 = vadd.f32 %v735_v59, %v292_v10  ;;  %v313_v15 = vadd.f32 %v562_v6, %v542_v12  ;;  %v563_v16 = vpop.f32.mrf.mxu1 }
  0xd7   :  { %v170_v17 = vpop.f32.mrf.mxu0 }
  0xd8   :  { %442 = vst.msk [vmem:[%s822_s5 + $0xc] sm:$0xf] %vm438_vm4, %v499_v13  ;;  %v497_v18 = vpack.c.bf16 %v359_v14, %v359_v14  ;;  %v364_v19 = vadd.f32 %v735_v59, %v313_v15  ;;  %v305_v20 = vadd.f32 %v304_v11, %v170_v17  ;;  %v307_v21 = vpop.f32.mrf.mxu1 }
  0xd9   :  { %v543_v22 = vpop.f32.mrf.mxu0 }
  0xda   :  { %440 = vst.msk [vmem:[%s822_s5 + $0x4] sm:$0xf] %vm438_vm4, %v497_v18  ;;  %v502_v23 = vpack.c.bf16 %v364_v19, %v364_v19  ;;  %v362_v24 = vadd.f32 %v735_v59, %v305_v20  ;;  %v316_v25 = vadd.f32 %v563_v16, %v543_v22  ;;  %v566_v26 = vpop.f32.mrf.mxu1 }
  0xdb   :  { %v173_v27 = vpop.f32.mrf.mxu0 }
  0xdc   :  { %445 = vst.msk [vmem:[%s822_s5 + $0x18] sm:$0xf] %vm438_vm4, %v502_v23  ;;  %v500_v28 = vpack.c.bf16 %v362_v24, %v362_v24  ;;  %v365_v29 = vadd.f32 %v735_v59, %v316_v25  ;;  %v308_v30 = vadd.f32 %v307_v21, %v173_v27  ;;  %v320_v31 = vpop.f32.mrf.mxu1 }
  0xdd   :  { %v546_v32 = vpop.f32.mrf.mxu0 }
  0xde   :  { %443 = vst.msk [vmem:[%s822_s5 + $0x10] sm:$0xf] %vm438_vm4, %v500_v28  ;;  %v503_v33 = vpack.c.bf16 %v365_v29, %v365_v29  ;;  %v363_v34 = vadd.f32 %v735_v59, %v308_v30  ;;  %v329_v35 = vadd.f32 %v566_v26, %v546_v32  ;;  %v567_v36 = vpop.f32.mrf.mxu1 }
  0xdf   :  { %v186_v37 = vpop.f32.mrf.mxu0 }
  0xe0   :  { %446 = vst.msk [vmem:[%s822_s5 + $0x1c] sm:$0xf] %vm438_vm4, %v503_v33  ;;  %v501_v38 = vpack.c.bf16 %v363_v34, %v363_v34  ;;  %v368_v39 = vadd.f32 %v735_v59, %v329_v35  ;;  %v321_v40 = vadd.f32 %v320_v31, %v186_v37  ;;  %v323_v41 = vpop.f32.mrf.mxu1 }
  0xe1   :  { %v547_v42 = vpop.f32.mrf.mxu0 }
  0xe2   :  { %444 = vst.msk [vmem:[%s822_s5 + $0x14] sm:$0xf] %vm438_vm4, %v501_v38  ;;  %v506_v43 = vpack.c.bf16 %v368_v39, %v368_v39  ;;  %v366_v44 = vadd.f32 %v735_v59, %v321_v40  ;;  %v332_v45 = vadd.f32 %v567_v36, %v547_v42  ;;  %v570_v46 = vpop.f32.mrf.mxu1 }
  0xe3   :  { %v189_v47 = vpop.f32.mrf.mxu0 }
  0xe4   :  { %449 = vst.msk [vmem:[%s822_s5 + $0x28] sm:$0xf] %vm438_vm4, %v506_v43  ;;  %v504_v48 = vpack.c.bf16 %v366_v44, %v366_v44  ;;  %v369_v49 = vadd.f32 %v735_v59, %v332_v45  ;;  %v324_v50 = vadd.f32 %v323_v41, %v189_v47  ;;  %v336_v51 = vpop.f32.mrf.mxu1 }
  0xe5   :  { %v550_v52 = vpop.f32.mrf.mxu0 }
  0xe6   :  { %447 = vst.msk [vmem:[%s822_s5 + $0x20] sm:$0xf] %vm438_vm4, %v504_v48  ;;  %v507_v53 = vpack.c.bf16 %v369_v49, %v369_v49  ;;  %v367_v54 = vadd.f32 %v735_v59, %v324_v50  ;;  %v345_v55 = vadd.f32 %v570_v46, %v550_v52  ;;  %v571_v57 = vpop.f32.mrf.mxu1 }
  0xe7   :  { %v202_v56 = vpop.f32.mrf.mxu0 }
  0xe8   :  { %450 = vst.msk [vmem:[%s822_s5 + $0x2c] sm:$0xf] %vm438_vm4, %v507_v53  ;;  %v505_v58 = vpack.c.bf16 %v367_v54, %v367_v54  ;;  %v372_v60 = vadd.f32 %v735_v59, %v345_v55  ;;  %v337_v61 = vadd.f32 %v336_v51, %v202_v56  ;;  %v339_v2 = vpop.f32.mrf.mxu1 }
  0xe9   :  { %v551_v62 = vpop.f32.mrf.mxu0 }
  0xea   :  { %448 = vst.msk [vmem:[%s822_s5 + $0x24] sm:$0xf] %vm438_vm4, %v505_v58  ;;  %v510_v63 = vpack.c.bf16 %v372_v60, %v372_v60  ;;  %v370_v0 = vadd.f32 %v735_v59, %v337_v61  ;;  %v348_v1 = vadd.f32 %v571_v57, %v551_v62 }
  0xeb   :  { %v205_v3 = vpop.f32.mrf.mxu0 }
  0xec   :  { %453 = vst.msk [vmem:[%s822_s5 + $0x38] sm:$0xf] %vm438_vm4, %v510_v63  ;;  %v508_v4 = vpack.c.bf16 %v370_v0, %v370_v0  ;;  %v373_v5 = vadd.f32 %v735_v59, %v348_v1  ;;  %v340_v6 = vadd.f32 %v339_v2, %v205_v3 }
  0xee   :  { %451 = vst.msk [vmem:[%s822_s5 + $0x30] sm:$0xf] %vm438_vm4, %v508_v4  ;;  %v511_v7 = vpack.c.bf16 %v373_v5, %v373_v5  ;;  %v371_v8 = vadd.f32 %v735_v59, %v340_v6 }
  0xf0   :  { %454 = vst.msk [vmem:[%s822_s5 + $0x3c] sm:$0xf] %vm438_vm4, %v511_v7  ;;  %v509_v9 = vpack.c.bf16 %v371_v8, %v371_v8 }
  0xf2   :  { %452 = vst.msk [vmem:[%s822_s5 + $0x34] sm:$0xf] %vm438_vm4, %v509_v9 }

</bundles_post_ra>
